<compile_context>
chip_gen: v5e
topology: v5e:2x2
jax: 0.10.0
libtpu: 0.0.40
codegen_flags: <defaults>
</compile_context>

<pallas_src>
import jax
import jax.numpy as jnp
import numpy as np
from jax.experimental import pallas as pl
from jax.experimental.pallas import tpu as pltpu

INTERVAL = 15
# Matches the PyTorch buffer: weight = float32(1/15) * (1 + arange(15)),
# computed in float32.
_WEIGHTS_F32 = (np.float32(1.0 / INTERVAL)
                * (1.0 + np.arange(INTERVAL, dtype=np.float32)))


def _sty_emb_mf_kernel(x_ref, sty_ref, len_ref):
    # x_ref:   (1, c, tile)  resident input tile (constant across the i axis)
    # sty_ref: (1, c, tile)  scaled copy i of batch element b, spatial tile s
    # len_ref: (1, 1, tile)  channel-wise L2 norm for (b, s); written at i == 0
    i = pl.program_id(2)

    # weight[i] = (i+1)/15 computed in f32 (matches the PyTorch f32 buffer).
    w = (i + 1).astype(jnp.float32) * (1.0 / INTERVAL)
    sty_ref[...] = (x_ref[...].astype(jnp.float32) * w).astype(sty_ref.dtype)

    # Channel-wise L2 norm: cross-sublane adds on the VPU, sqrt on the EUP.
    # Only computed/stored once per (batch, spatial tile); the len block stays
    # resident across the (arbitrary) i axis and is written back afterwards.
    @pl.when(i == 0)
    def _():
        xf = x_ref[0].astype(jnp.float32)                      # (c, tile)
        len_ref[0] = jnp.sqrt(
            jnp.sum(xf * xf, axis=0, keepdims=True)).astype(len_ref.dtype)


def _pick_spatial_tile(c, hw, itemsize, budget_bytes):
    """Largest spatial tile (divisor of hw, lane-dense) fitting the VMEM budget.

    Per-step VMEM ~= 2*(input block) + 2*(sty block) + len block
                  ~= (4*c + 2) * tile * itemsize   (double-buffered).
    """
    per_lane = (4 * c + 2) * itemsize
    if per_lane * hw <= budget_bytes:
        return hw                      # no spatial tiling needed
    best = None
    for n_tiles in range(2, hw + 1):
        if hw % n_tiles:
            continue
        tile = hw // n_tiles
        if tile % 128 != 0:            # keep stores lane-dense / unmasked
            continue
        if per_lane * tile <= budget_bytes:
            best = tile
            break
    # Fallback: no lane-dense divisor fits -> keep full hw and rely on the
    # explicit vmem_limit_bytes (correct, possibly single-buffered).
    return best if best is not None else hw


def sty_emb_mf(stylecode, *, vmem_budget_bytes=16 * 1024 * 1024):
    """Pallas forward of StyEmbMf.  Returns (stylecode_scaled, stycode_len)."""
    bs, c, h, w = stylecode.shape
    hw = h * w
    itemsize = np.dtype(stylecode.dtype).itemsize

    tile = _pick_spatial_tile(c, hw, itemsize, vmem_budget_bytes)
    n_sp = hw // tile

    # Lane-dense view: (bs, c, hw) keeps the trailing dim a big multiple of 128
    # (free, layout-preserving reshape on a contiguous array).
    x2 = stylecode.reshape(bs, c, hw)

    cost = pl.CostEstimate(
        flops=int(bs * c * hw * (2 + INTERVAL)),          # square+sum + 15 muls
        transcendentals=int(bs * hw),                     # sqrt per pixel
        bytes_accessed=int((1 + INTERVAL) * bs * c * hw * itemsize
                           + bs * hw * itemsize),
    )

    out_sty, out_len = pl.pallas_call(
        _sty_emb_mf_kernel,
        out_shape=(
            jax.ShapeDtypeStruct((bs * INTERVAL, c, hw), stylecode.dtype),
            jax.ShapeDtypeStruct((bs, 1, hw), stylecode.dtype),
        ),
        grid_spec=pltpu.PrefetchScalarGridSpec(
            num_scalar_prefetch=0,
            # i innermost ("arbitrary") so the len block stays resident and the
            # input tile (index_map constant in i) is fetched exactly once.
            grid=(bs, n_sp, INTERVAL),
            in_specs=[
                pl.BlockSpec((1, c, tile), lambda b, s, i: (b, 0, s)),
            ],
            out_specs=[
                # copy i of batch element b -> output row b*INTERVAL + i
                pl.BlockSpec((1, c, tile), lambda b, s, i: (b * INTERVAL + i, 0, s)),
                pl.BlockSpec((1, 1, tile), lambda b, s, i: (b, 0, s)),
            ],
        ),
        compiler_params=pltpu.CompilerParams(
            dimension_semantics=("parallel", "parallel", "arbitrary"),
            vmem_limit_bytes=32 * 1024 * 1024,
        ),
        cost_estimate=cost,
    )(x2)

    return (out_sty.reshape(bs * INTERVAL, c, h, w),
            out_len.reshape(bs, h, w))


def _reference(stylecode):
    """Pure-JAX reference mirroring the PyTorch forward."""
    bs, c, h, w = stylecode.shape
    stycode_len = jnp.sqrt(
        jnp.sum(stylecode.astype(jnp.float32) ** 2, axis=1)
    ).astype(stylecode.dtype)
    weight = jnp.asarray(_WEIGHTS_F32)
    sty = stylecode[:, None].astype(jnp.float32) * weight[None, :, None, None, None]
    sty = sty.reshape(bs * INTERVAL, c, h, w).astype(stylecode.dtype)
    return sty, stycode_len


if __name__ == "__main__":
    key = jax.random.PRNGKey(0)
    bs, c, h, w = 2, 4, 16, 16
    stylecode = jax.random.normal(key, (bs, c, h, w), dtype=jnp.float32)

    out_sty, out_len = sty_emb_mf(stylecode)
    jax.block_until_ready(out_sty)
    jax.block_until_ready(out_len)

    ref_sty, ref_len = _reference(stylecode)
    np.testing.assert_allclose(np.asarray(out_sty), np.asarray(ref_sty),
                               rtol=1e-5, atol=1e-6)
    np.testing.assert_allclose(np.asarray(out_len), np.asarray(ref_len),
                               rtol=1e-5, atol=1e-6)

    print("KERNEL_OK")
</pallas_src>

<mosaic_0001>
module attributes {stable_mosaic.version = 11 : i64} {
  func.func @_sty_emb_mf_kernel(%arg0: i32, %arg1: i32, %arg2: i32, %arg3: memref<1x4x256xf32, #tpu.memory_space<vmem>>, %arg4: memref<1x4x256xf32, #tpu.memory_space<vmem>>, %arg5: memref<1x1x256xf32, #tpu.memory_space<vmem>>) attributes {dimension_semantics = [#tpu.dimension_semantics<parallel>, #tpu.dimension_semantics<parallel>, #tpu.dimension_semantics<arbitrary>], iteration_bounds = array<i64: 2, 1, 15>, scalar_prefetch = 0 : i64, scratch_operands = 0 : i64, tpu.core_type = #tpu.core_type<tc>, window_params = [{transform_indices = @transform_0, window_bounds = array<i64: 1, 4, 256>}, {transform_indices = @transform_1, window_bounds = array<i64: 1, 4, 256>}, {transform_indices = @transform_2, window_bounds = array<i64: 1, 1, 256>}]} {
    %c1_i32 = arith.constant 1 : i32
    %0 = arith.addi %arg2, %c1_i32 : i32
    %1 = arith.sitofp %0 : i32 to f32
    %cst = arith.constant 0.0666666701 : f32
    %2 = arith.mulf %1, %cst : f32
    %c0 = arith.constant 0 : index
    %c0_0 = arith.constant 0 : index
    %c0_1 = arith.constant 0 : index
    %3 = vector.load %arg3[%c0, %c0_0, %c0_1] : memref<1x4x256xf32, #tpu.memory_space<vmem>>, vector<1x4x256xf32>
    %4 = vector.broadcast %2 : f32 to vector<1x4x256xf32>
    %5 = arith.mulf %3, %4 : vector<1x4x256xf32>
    %c0_2 = arith.constant 0 : index
    %c0_3 = arith.constant 0 : index
    %c0_4 = arith.constant 0 : index
    %6 = vector.load %arg4[%c0_2, %c0_3, %c0_4] : memref<1x4x256xf32, #tpu.memory_space<vmem>>, vector<1x4x256xf32>
    tpu.vector_store %arg4[%c0_2, %c0_3, %c0_4], %5 {strides = array<i32>} : memref<1x4x256xf32, #tpu.memory_space<vmem>>, vector<1x4x256xf32>,
    %c0_i32 = arith.constant 0 : i32
    %7 = arith.cmpi eq, %arg2, %c0_i32 : i32
    %8 = arith.extui %7 : i1 to i32
    %c0_i32_5 = arith.constant 0 : i32
    %9 = arith.cmpi ne, %8, %c0_i32_5 : i32
    scf.if %9 {
      %c0_6 = arith.constant 0 : index
      %c0_7 = arith.constant 0 : index
      %c0_8 = arith.constant 0 : index
      %10 = vector.load %arg3[%c0_6, %c0_7, %c0_8] : memref<1x4x256xf32, #tpu.memory_space<vmem>>, vector<1x4x256xf32>
      %11 = vector.shape_cast %10 : vector<1x4x256xf32> to vector<4x256xf32>
      %12 = arith.mulf %11, %11 : vector<4x256xf32>
      %cst_9 = arith.constant dense<0.000000e+00> : vector<256xf32>
      %13 = vector.multi_reduction <add>, %12, %cst_9 [0] : vector<4x256xf32> to vector<256xf32>
      %14 = vector.shape_cast %13 : vector<256xf32> to vector<1x256xf32>
      %15 = math.sqrt %14 : vector<1x256xf32>
      %c0_10 = arith.constant 0 : index
      %c0_11 = arith.constant 0 : index
      %c0_12 = arith.constant 0 : index
      %16 = vector.load %arg5[%c0_10, %c0_11, %c0_12] : memref<1x1x256xf32, #tpu.memory_space<vmem>>, vector<1x1x256xf32>
      %17 = vector.shape_cast %16 : vector<1x1x256xf32> to vector<1x256xf32>
      %18 = vector.shape_cast %15 : vector<1x256xf32> to vector<1x1x256xf32>
      tpu.vector_store %arg5[%c0_10, %c0_11, %c0_12], %18 {strides = array<i32>} : memref<1x1x256xf32, #tpu.memory_space<vmem>>, vector<1x1x256xf32>,
    } else {
    }
    return
  }
  func.func @transform_0(%arg0: i32, %arg1: i32, %arg2: i32) -> (i32, i32, i32) {
    %c0_i32 = arith.constant 0 : i32
    %c0_i32_0 = arith.constant 0 : i32
    return %arg0, %c0_i32, %arg1 : i32, i32, i32
  }
  func.func @transform_1(%arg0: i32, %arg1: i32, %arg2: i32) -> (i32, i32, i32) {
    %c15_i32 = arith.constant 15 : i32
    %0 = arith.muli %arg0, %c15_i32 : i32
    %1 = arith.addi %0, %arg2 : i32
    %c0_i32 = arith.constant 0 : i32
    %c0_i32_0 = arith.constant 0 : i32
    return %1, %c0_i32, %arg1 : i32, i32, i32
  }
  func.func @transform_2(%arg0: i32, %arg1: i32, %arg2: i32) -> (i32, i32, i32) {
    %c0_i32 = arith.constant 0 : i32
    %c0_i32_0 = arith.constant 0 : i32
    return %arg0, %c0_i32, %arg1 : i32, i32, i32
  }
}

</mosaic_0001>

<bundles_post_ra>
// kernel: tpu_custom_call.1
= control target key start
LH: loop header
LB: loop body
LE: loop exit
PB: predicated region body
PF: predicated region fallthrough
CT: control target
= control target key end

     0   :  { %s1016_s0 = inlined_call_operand.hbm [shape: f32[2,4,256], index: 0, kind: input, shape index: {}]   ;;  %s1017_s1 = inlined_call_operand.hbm [shape: f32[30,4,256], index: 1, kind: output, shape index: {0}]   ;;  %s1018_s2 = inlined_call_operand.hbm [shape: f32[2,1,256], index: 2, kind: output, shape index: {1}]  }
   0x1   :  { %1026 = sst [smem:[#allocation19_spill]] %s1016_s0 }
   0x2   :  { %8 = vsyncpa [#allocation3], 0 }
   0x3   :  { %10 = vsyncpa [#allocation3 + $0x1], 0 }
   0x4   :  { %11 = vsyncpa [#allocation4], 0 }
   0x5   :  { %13 = vsyncpa [#allocation4 + $0x1], 0 }
   0x6   :  { %14 = vsyncpa [#allocation7], 0 }
   0x7   :  { %16 = vsyncpa [#allocation7 + $0x1], 0  ;;  %s780_s9 = smov 0   ;;  %s782_s10 = smov 0  }
   0x8   :  { %s784_s11 = smov 0   ;;  %s786_s12 = smov 0  }
   0x9   :  { %s788_s13 = smov 0   ;;  %s790_s14 = smov 0  }
   0xa   :  { %s792_s15 = smov 0   ;;  %s794_s16 = smov 0  }
   0xb   :  { %s796_s17 = smov 0   ;;  %s798_s18 = smov 0  }
   0xc   :  { %s800_s19 = smov 0  }
   0xd LB: > { %1027 = sst [smem:[#allocation11_spill]] %s739_s13  ;;  %s447_s20 = sadd.s32 4294967295, %s763_s19   ;;  %s763_s19 = sphi %s800_s19, %s22_s19   ;;  %s759_s18 = sphi %s798_s18, %s1050_s18   ;;  %s755_s17 = sphi %s796_s17, %s1049_s17   ;;  %s751_s16 = sphi %s794_s16, %s1048_s16   ;;  %s747_s15 = sphi %s792_s15, %s1047_s15   ;;  %s743_s14 = sphi %s790_s14, %s1046_s14   ;;  %s739_s13 = sphi %s788_s13, %s1054_s13   ;;  %s735_s12 = sphi %s786_s12, %s1044_s12   ;;  %s731_s11 = sphi %s784_s11, %s1053_s11   ;;  %s727_s10 = sphi %s782_s10, %s1052_s10   ;;  %s723_s9 = sphi %s780_s9, %s1051_s9  }
   0xe   : > { %1028 = sst [smem:[#allocation12_spill]] %s743_s14  ;;  %s448_s21 = sadd.s32 4294967294, %s763_s19  }
   0xf   : > { %1029 = sst [smem:[#allocation13_spill]] %s755_s17  ;;  %s34_s22 = sadd.s32 1, %s755_s17 }
  0x10   : > { %1030 = sst [smem:[#allocation14_spill]] %s759_s18  ;;  %s41_s23 = sadd.s32 1, %s759_s18 }
  0x11   : > { %p35_p0 = scmp.ge.s32.totalorder %s34_s22, 15  ;;  %s50_s24 = sadd.s32 1, %s743_s14 }
  0x12   : > { %p57_p1 = scmp.ne.s32.totalorder %s743_s14, %s739_s13  ;;  %p58_p2 = scmp.eq.s32.totalorder %s763_s19, 0 }
  0x13   : > { %s1056_s22 = smov (%p35_p0, %s34_s22), 0  ;;  %s1058_s23 = smov (!%p35_p0, %s41_s23), %s759_s18 }
  0x14   : > { %1031 = sst [smem:[#allocation15_spill]] %s1056_s22  ;;  %p849_p3 = por %p58_p2, %p57_p1 }
  0x15   : > { %p63_p4 = scmp.ne.s32.totalorder %s739_s13, %s735_s12  ;;  %p43_p5 = scmp.ge.s32.totalorder %s1058_s23, 2 }
  0x16   : > { %p64_p6 = scmp.eq.s32.totalorder %s447_s20, 0  ;;  %s73_s26 = smul.u32 15, %s759_s18 }
  0x17   : > { %s82_s27 = sadd.s32 1, %s731_s11  ;;  %s1060_s23 = smov (%p43_p5, %s1058_s23), 0 }
  0x18   : > { %1033 = sst [smem:[#allocation16_spill]] %s1060_s23  ;;  %p862_p7 = por %p64_p6, %p63_p4 }
  0x19   : > { %s74_s29 = sadd.s32 %s755_s17, %s73_s26  ;;  %s45_s30 = ssub.s32 %s759_s18, %s1060_s23 }
  0x1a   : > { %s75_s3 = smul.u32 15, %s1060_s23  ;;  %p48_p8 = scmp.eq.s32.totalorder %s45_s30, 0 }
  0x1b   : > { %p92_p9 = scmp.ne.s32.totalorder %s731_s11, %s727_s10  ;;  %p93_p10 = scmp.eq.s32.totalorder %s447_s20, 29 }
  0x1c   : > { %s76_s4 = sadd.s32 %s75_s3, %s1056_s22  ;;  %p98_p13 = scmp.ne.s32.totalorder %s727_s10, %s723_s9 }
  0x1d   : > { %s874_s5 = scalar_select %p48_p8, %s743_s14, %s50_s24  }
  0x1e   : > { %s77_s6 = ssub.s32 %s74_s29, %s76_s4  ;;  %p876_p11 = por %p93_p10, %p92_p9 }
  0x1f   : > { %1035 = sst [smem:[#allocation17_spill]] %s874_s5  ;;  %p80_p12 = scmp.eq.s32.totalorder %s77_s6, 0 }
  0x20   : > { %p99_p0 = scmp.eq.s32.totalorder %s448_s21, 29  ;;  %p887_p2 = por %p93_p10, %p57_p1 }
  0x21   : > { %s892_s20 = scalar_select %p80_p12, %s731_s11, %s82_s27  }
  0x22   : > { %p894_p5 = por %p99_p0, %p98_p13  ;;  %p901_p6 = por %p99_p0, %p63_p4 }
  0x23   : > { %1038 = sst [smem:[#allocation18_spill]] %s892_s20  ;;  %p485_p8 = scmp.lt.s32.totalorder %s763_s19, 30 }
  0x24   : > { %s147_s21 = sand.u32 1, %s743_s14   ;;  %s466_s29 = sshll.u32 %s759_s18, 3 }
  0x25   : > { %s451_s30 = sshll.u32 %s147_s21, 3  ;;  %s1041_s0 = sld [smem:[#allocation19_spill]] }
  0x26   : > { %s151_s27 = scalar_lea.vmem [#allocation2], %s451_s30  ;;  %p475_p1 = pnand %p485_p8, %p849_p3 }
  0x27   : > { %s162_s22 = sshll.u32 %s151_s27, 4  ;;  %p454_p9 = scmp.ge.s32.totalorder %s763_s19, 1  ;;  %s163_s22 = int_to_ptr.vmem [resolvable:$true] %s162_s22 }
  0x28   : > { %p167_p4 = scmp.lt.s32.totalorder %s763_s19, 31  ;;  %s148_s17 = scalar_lea.sflag [#allocation3], %s147_s21 }
  0x2a   : > { %p168_p10 = pnand %p454_p9, %p167_p4 }
  0x2b   : > { %s158_s6 = scalar_lea.hbm %s1041_s0, %s466_s29  ;;  %s916_s18 = sand.u32 (!%p168_p10), 1, %s739_s13  }
  0x2c   : > { %s160_s23 = sshll.u32 %s158_s6, 4  ;;  %171 = sbr.rel (%p168_p10) target bundleno = 141 (0x8d), region = 24  ;;  %s161_s23 = int_to_ptr.hbm [resolvable:$true] %s160_s23 }
  0x2d   : > { %477 = dma.hbm_to_vmem [thread:$0]  (!%p475_p1), %s161_s23, 128, %s163_s22, %s148_s17  }
  0x2e   : > { %s455_s29 = sshll.u32 (!%p168_p10), %s916_s18, 3  ;;  %s174_s3 = scalar_lea.sflag (!%p168_p10), [#allocation3], %s916_s18 }
  0x2f   : > { %s177_s30 = scalar_lea.vmem (!%p168_p10), [#allocation2], %s455_s29 }
  0x31   : > { %710 = dma.done.wait (%p862_p7), %s174_s3, 128  }
  0x32   : > { %712 = vsyncadd (%p862_p7), %s174_s3, 4294967168  ;;  %s457_s17 = sshll.u32 %s916_s18, 1  ;;  %s1023_s22 = sand.u32 1, %s727_s10   ;;  %v212_v0 = vld [vmem:[%s177_s30] sm:$0xff] }
  0x33   : > { %s209_s23 = sadd.s32 1, %s747_s15  ;;  %s929_s21 = sshll.u32 %s1023_s22, 3 }
  0x34   : > { %s210_s25 = scvt.s32.f32 %s209_s23  ;;  %s196_s6 = scalar_lea.vmem [#allocation5], %s929_s21 }
  0x35   : > { %s934_s28 = scalar_lea.vmem [#allocation6], %s457_s17  ;;  %p458_p3 = scmp.ne.s32.totalorder %s747_s15, 0 }
  0x36   : > { %s211_s4 = smul.f32 0.06666667, %s210_s25 }
  0x37   : > { %219 = sbr.rel (%p458_p3) target bundleno = 110 (0x6e), region = 32 }
  0x38   : > { %v213_v1 = vstv %s211_s4 }
  0x39   : > { %v214_v2 = vmul.f32 %v213_v1, %v212_v0 }
  0x3b   : > { %215 = vst [vmem:[%s196_s6] sm:$0xff] %v214_v2 }
  0x3c   : > { %v220_v3 = vld [vmem:[%s177_s30] sm:$0xff]  ;;  %vm228_vm0 = vcmask 1043456   ;;  %v273_v35 = vlaneseq  ;;  %vm270_vm4 = vcmask 1040384  }
  0x3d   : > { %v221_v4 = vmul.f32 %v220_v3, %v220_v3 }
  0x3e   : > { %vm275_vm6 = vcmp.lt.s32.totalorder %v273_v35, 256 }
  0x3f   : > { %223 = vst [vmem:[#allocation1] ss:$2 sm:$0xff] %v221_v4 }
  0x46   : > { %v224_v5 = vld.sshfl [vmem:[#allocation1] sm:$0xff pattern:$0x75316420]  ;;  %v225_v6 = vld.sshfl [vmem:[#allocation1 + $0x8] sm:$0xff pattern:$0x75316420] }
  0x47   : > { %v229_v7 = vsel %vm228_vm0, %v224_v5, 0.0  ;;  %v236_v8 = vsel %vm228_vm0, %v225_v6, 0.0 }
  0x48   : > { %v230_v9 = vrot.slane %v229_v7, 4  ;;  %v237_v10 = vrot.slane %v236_v8, 4 }
  0x4a   : > { %v238_v11 = vadd.f32 %v237_v10, %v236_v8  ;;  %v231_v12 = vadd.f32 %v230_v9, %v229_v7 }
  0x4c   : > { %v239_v13 = vrot.slane %v238_v11, 2  ;;  %v232_v14 = vrot.slane %v231_v12, 2 }
  0x4e   : > { %v233_v15 = vadd.f32 %v232_v14, %v231_v12  ;;  %v240_v16 = vadd.f32 %v239_v13, %v238_v11 }
  0x50   : > { %v234_v17 = vrot.slane %v233_v15, 1  ;;  %v241_v18 = vrot.slane %v240_v16, 1 }
  0x52   : > { %v235_v19 = vadd.f32 %v234_v17, %v233_v15  ;;  %v242_v20 = vadd.f32 %v241_v18, %v240_v16 }
  0x54   : > { %575 = vrsqrt.f32 %v235_v19  ;;  %vm250_vm1 = vcmp.eq.f32.partialorder %v235_v19, inf  ;;  %vm262_vm2 = vcmp.eq.f32.partialorder %v242_v20, inf  ;;  %v265_v36 = vand.u32 2147483648, %v242_v20 }
  0x55   : > { %577 = vrsqrt.f32 %v242_v20  ;;  %vm264_vm3 = vcmp.eq.f32.partialorder %v242_v20, 0.0  ;;  %v253_v39 = vand.u32 2147483648, %v235_v19  ;;  %vm252_vm5 = vcmp.eq.f32.partialorder %v235_v19, 0.0 }
  0x5a   : > { %v576_v21 = vpop.eup %575 }
  0x5b   : > { %v578_v22 = vpop.eup %577  ;;  %v244_v23 = vmul.f32 %v576_v21, %v235_v19 }
  0x5c   : > { %v256_v24 = vmul.f32 %v578_v22, %v242_v20 }
  0x5d   : > { %v245_v25 = vmul.f32 %v576_v21, %v244_v23 }
  0x5e   : > { %v257_v26 = vmul.f32 %v578_v22, %v256_v24 }
  0x5f   : > { %v246_v27 = vmul.f32 0.5, %v245_v25 }
  0x60   : > { %v258_v28 = vmul.f32 0.5, %v257_v26 }
  0x61   : > { %v247_v29 = vsub.f32 1.5, %v246_v27 }
  0x62   : > { %v259_v30 = vsub.f32 1.5, %v258_v28 }
  0x63   : > { %v248_v31 = vmul.f32 %v576_v21, %v247_v29 }
  0x64   : > { %v260_v32 = vmul.f32 %v578_v22, %v259_v30 }
  0x65   : > { %v249_v33 = vmul.f32 %v248_v31, %v235_v19 }
  0x66   : > { %v261_v34 = vmul.f32 %v260_v32, %v242_v20 }
  0x67   : > { %v251_v37 = vsel %vm250_vm1, %v235_v19, %v249_v33 }
  0x68   : > { %v263_v38 = vsel %vm262_vm2, %v242_v20, %v261_v34  ;;  %v254_v42 = vsel %vm252_vm5, %v253_v39, %v251_v37 }
  0x69   : > { %v266_v40 = vsel %vm264_vm3, %v265_v36, %v263_v38 }
  0x6a   : > { %v269_v41 = vrot.slane %v266_v40, 7 }
  0x6c   : > { %v271_v43 = vsel %vm270_vm4, %v254_v42, %v269_v41 }
  0x6d   : > { %277 = vst.msk [vmem:[%s934_s28] sm:$0x3] %vm275_vm6, %v271_v43 }
  0x6e PF: > { %s291_s27 = smul.u32 15, %s751_s16  ;;  %s301_s29 = sshll.u32 %s196_s6, 4  ;;  %s302_s29 = int_to_ptr.vmem [resolvable:$true] %s301_s29 }
  0x6f   : > { %s463_s17 = sshll.u32 %s751_s16, 1  ;;  %s317_s13 = sshll.u32 %s934_s28, 4  ;;  %s950_s13 = int_to_ptr.vmem [resolvable:$true] %s317_s13 }
  0x70   : > { %s292_s3 = sadd.s32 %s747_s15, %s291_s27  ;;  %s315_s5 = scalar_lea.hbm %s1018_s2, %s463_s17 }
  0x71   : > { %s467_s30 = sshll.u32 %s292_s3, 3  ;;  %s1042_s21 = sand.u32 1, %s727_s10  }
  0x72   : > { %s299_s4 = scalar_lea.hbm %s1017_s1, %s467_s30  ;;  %s279_s6 = scalar_lea.sflag [#allocation4], %s1042_s21 }
  0x73   : > { %s303_s14 = sshll.u32 %s299_s4, 4  ;;  %s629_s3 = scalar_lea.hbm %s1017_s1, 240  ;;  %s304_s14 = int_to_ptr.hbm [resolvable:$true] %s303_s14 }
  0x74   : > { %s623_s20 = sshra.s32 %s304_s14, 4  ;;  %s624_s20 = int_to_ptr.hbm [resolvable:$true] %s623_s20 }
  0x75   : > { %s625_s15 = scalar_lea.hbm %s624_s20, 8  ;;  %p630_p0 = scmp.lt.s32.totalorder %s624_s20, %s1017_s1 }
  0x76   : > { %p626_p7 = scmp.ne.s32.totalorder %s624_s20, %s625_s15  ;;  %p631_p8 = scmp.lt.s32.totalorder %s629_s3, %s625_s15 }
  0x78   : > { %p627_p12 = pnand %p626_p7, %p876_p11  ;;  %p632_p1 = por %p631_p8, %p630_p0 }
  0x7a   : > { %p628_p13 = pneg %p627_p12 }
  0x7c   : > { %p633_p9 = pnand %p632_p1, %p628_p13 }
  0x7e   : > { %636 = shalt.err (!%p633_p9)
}
  0x7f   : > { %470 = dma.vmem_to_hbm [thread:$0]  (%p876_p11), %s302_s29, 128, %s304_s14, %s279_s6  }
  0x80   : > { %s319_s28 = sshll.u32 %s315_s5, 4  ;;  %s284_s30 = scalar_lea.sflag [#allocation7], %s916_s18  ;;  %s320_s28 = int_to_ptr.hbm [resolvable:$true] %s319_s28 }
  0x81   : > { %s651_s17 = sshra.s32 %s320_s28, 4  ;;  %s657_s4 = scalar_lea.hbm %s1018_s2, 4  ;;  %s652_s17 = int_to_ptr.hbm [resolvable:$true] %s651_s17 }
  0x82   : > { %s653_s23 = scalar_lea.hbm %s652_s17, 2  ;;  %p658_p7 = scmp.lt.s32.totalorder %s652_s17, %s1018_s2 }
  0x83   : > { %p654_p4 = scmp.ne.s32.totalorder %s652_s17, %s653_s23  ;;  %p659_p12 = scmp.lt.s32.totalorder %s657_s4, %s653_s23 }
  0x85   : > { %p655_p10 = pnand %p654_p4, %p887_p2  ;;  %p660_p11 = por %p659_p12, %p658_p7 }
  0x87   : > { %p656_p3 = pneg %p655_p10 }
  0x89   : > { %p661_p13 = pnand %p660_p11, %p656_p3 }
  0x8b   : > { %664 = shalt.err (!%p661_p13)
}
  0x8c   : > { %471 = dma.vmem_to_hbm [thread:$0]  (%p887_p2), %s950_s13, 32, %s320_s28, %s284_s30  }
  0x8d PF: > { %p486_p0 = scmp.ge.s32.totalorder %s763_s19, 2  ;;  %s331_s14 = sand.u32 1, %s723_s9  }
  0x8e   : > { %s332_s18 = scalar_lea.sflag [#allocation4], %s331_s14 }
  0x8f   : > { %p479_p8 = pnand %p486_p0, %p894_p5 }
  0x91   : > { %p480_p1 = pneg %p479_p8 }
  0x93   : > { %714 = dma.done.wait (%p480_p1), %s332_s18, 128  }
  0x94   : > { %716 = vsyncadd (%p480_p1), %s332_s18, 4294967168  ;;  %s341_s5 = sand.u32 1, %s735_s12   ;;  %p482_p9 = pnand %p486_p0, %p901_p6 }
  0x95   : > { %s342_s7 = scalar_lea.sflag [#allocation7], %s341_s5 }
  0x96   : > { %p483_p4 = pneg %p482_p9 }
  0x98   : > { %718 = dma.done.wait (%p483_p4), %s342_s7, 32  }
  0x99   : > { %720 = vsyncadd (%p483_p4), %s342_s7, 4294967264  ;;  %s22_s19 = sadd.s32 1, %s763_s19   ;;  %s1043_s13 = sld [smem:[#allocation18_spill]] }
  0x9a   : > { %p19_p2 = scmp.ge.s32.totalorder %s22_s19, 32   ;;  %s1044_s12 = sld [smem:[#allocation11_spill]] }
  0x9b   : > { %s1045_s8 = sld [smem:[#allocation12_spill]]  ;;  %s1051_s9 = smov %s727_s10 }
  0x9c   : > { %s1046_s14 = sld [smem:[#allocation17_spill]]  ;;  %s1052_s10 = smov %s731_s11 }
  0x9d   : > { %s1047_s15 = sld [smem:[#allocation13_spill]]  ;;  %21 = sbr.rel (!%p19_p2) target bundleno = 13 (0xd), region = 90 }
  0x9e   : > { %s1048_s16 = sld [smem:[#allocation14_spill]] }
  0x9f   : > { %s1049_s17 = sld [smem:[#allocation15_spill]]  ;;  %s1053_s11 = smov %s1043_s13 }
  0xa0   : > { %s1050_s18 = sld [smem:[#allocation16_spill]] }
  0xa1   : > { %s1054_s13 = smov %s1045_s8 }
  0xa2   :  { %348 = vsyncpa [#allocation3], 1 }
  0xa3   :  { %350 = vsyncpa [#allocation3 + $0x1], 1 }
  0xa4   :  { %351 = vsyncpa [#allocation4], 1 }
  0xa5   :  { %353 = vsyncpa [#allocation4 + $0x1], 1 }
  0xa6   :  { %354 = vsyncpa [#allocation7], 1 }
  0xa7   :  { %356 = vsyncpa [#allocation7 + $0x1], 1 }

</bundles_post_ra>
